<compile_context>
chip_gen: v5e
topology: v5e:2x2
jax: 0.10.0
libtpu: 0.0.40
codegen_flags: <defaults>
</compile_context>

<pallas_src>
import jax
import jax.numpy as jnp
from jax.experimental import pallas as pl
from jax.experimental.pallas import tpu as pltpu

LANE = 128
SUBLANE = 8


def _round_up(n, m):
    return ((n + m - 1) // m) * m


def pc_mlp_kernel(x_ref, w1_ref, b1_ref, w2_ref, b2_ref,
                  w3_ref, b3_ref, w4_ref, b4_ref, out_ref):
    """Fused 4-layer MLP on one (TB, D0) batch tile.

    All weight refs are (in_pad, out_pad) bf16; biases are (1, out_pad) f32.
    Zero-padded columns stay exactly zero through ReLU (0*w + 0 bias -> 0).
    """
    h = jnp.dot(x_ref[...], w1_ref[...], preferred_element_type=jnp.float32)
    h = jnp.maximum(h + b1_ref[...], 0.0).astype(jnp.bfloat16)

    h = jnp.dot(h, w2_ref[...], preferred_element_type=jnp.float32)
    h = jnp.maximum(h + b2_ref[...], 0.0).astype(jnp.bfloat16)

    h = jnp.dot(h, w3_ref[...], preferred_element_type=jnp.float32)
    h = jnp.maximum(h + b3_ref[...], 0.0).astype(jnp.bfloat16)

    h = jnp.dot(h, w4_ref[...], preferred_element_type=jnp.float32)
    out_ref[...] = h + b4_ref[...]


def prepare_params(weights, biases):
    """One-time param prep (do this at init, not per forward call).

    weights[i]: torch-layout (out_i, in_i) f32;  biases[i]: (out_i,) f32.
    Returns [(w_t_padded_bf16, bias_padded_f32), ...] with the transpose to
    (in, out) and zero-padding of feature dims to multiples of 128 done once.
    """
    prepped = []
    for w, b in zip(weights, biases):
        out_d, in_d = w.shape
        in_p, out_p = _round_up(in_d, LANE), _round_up(out_d, LANE)
        wt = jnp.zeros((in_p, out_p), jnp.float32).at[:in_d, :out_d].set(w.T)
        bp = jnp.zeros((1, out_p), jnp.float32).at[0, :out_d].set(b)
        prepped.append((wt.astype(jnp.bfloat16), bp))
    return prepped


def pc_classifier_forward(x, prepped, *, num_classes=55, tb=256):
    """x: (B, hidden_rep_dim) f32.  Returns (B, num_classes) f32 logits."""
    B, D0 = x.shape
    (w1t, b1), (w2t, b2), (w3t, b3), (w4t, b4) = prepped
    P0, P1 = w1t.shape
    P2, P3, P4 = w2t.shape[1], w3t.shape[1], w4t.shape[1]
    assert w2t.shape[0] == P1 and w3t.shape[0] == P2 and w4t.shape[0] == P3
    assert D0 <= P0

    # Batch tile: multiple of 8 sublanes, never bigger than the (padded) batch.
    tb = _round_up(min(tb, _round_up(B, SUBLANE)), SUBLANE)
    Bp = _round_up(B, tb)

    # Pad input once: batch rows to a tile multiple, features to lane multiple,
    # cast to bf16 for the MXU.
    xp = jnp.zeros((Bp, P0), jnp.bfloat16).at[:B, :D0].set(x.astype(jnp.bfloat16))

    full = lambda i: (0, 0)  # weights/biases stay VMEM-resident across grid steps
    grid = (Bp // tb,)

    out = pl.pallas_call(
        pc_mlp_kernel,
        out_shape=jax.ShapeDtypeStruct((Bp, P4), jnp.float32),
        grid=grid,
        in_specs=[
            pl.BlockSpec((tb, P0), lambda i: (i, 0)),   # x tile
            pl.BlockSpec((P0, P1), full), pl.BlockSpec((1, P1), full),  # fc1
            pl.BlockSpec((P1, P2), full), pl.BlockSpec((1, P2), full),  # fc2
            pl.BlockSpec((P2, P3), full), pl.BlockSpec((1, P3), full),  # fc3
            pl.BlockSpec((P3, P4), full), pl.BlockSpec((1, P4), full),  # fc4
        ],
        out_specs=pl.BlockSpec((tb, P4), lambda i: (i, 0)),
        compiler_params=pltpu.CompilerParams(
            dimension_semantics=("parallel",)),
    )(xp, w1t, b1, w2t, b2, w3t, b3, w4t, b4)

    return out[:B, :num_classes]


if __name__ == "__main__":
    # Small shapes consistent with the module (opt.hidden_rep_dim -> 512 -> 128 -> 64 -> 55).
    B = 16
    HIDDEN_REP_DIM = 256
    NUM_CLASSES = 55

    key = jax.random.PRNGKey(0)
    keys = jax.random.split(key, 9)

    layer_dims = [(512, HIDDEN_REP_DIM), (128, 512), (64, 128), (NUM_CLASSES, 64)]
    weights, biases = [], []
    for i, (out_d, in_d) in enumerate(layer_dims):
        scale = 1.0 / jnp.sqrt(in_d)  # mimic nn.Linear default init range
        weights.append(jax.random.uniform(keys[2 * i], (out_d, in_d),
                                          jnp.float32, -scale, scale))
        biases.append(jax.random.uniform(keys[2 * i + 1], (out_d,),
                                         jnp.float32, -scale, scale))

    x = jax.random.normal(keys[8], (B, HIDDEN_REP_DIM), jnp.float32)

    prepped = prepare_params(weights, biases)          # one-time param prep
    logits = pc_classifier_forward(x, prepped, num_classes=NUM_CLASSES, tb=8)
    jax.block_until_ready(logits)

    # Pure-JAX reference with matching bf16 MXU inputs / f32 accumulation.
    def lin(h, w, b):
        return jnp.dot(h.astype(jnp.bfloat16), w.T.astype(jnp.bfloat16),
                       preferred_element_type=jnp.float32) + b

    h = jnp.maximum(lin(x, weights[0], biases[0]), 0.0)
    h = jnp.maximum(lin(h, weights[1], biases[1]), 0.0)
    h = jnp.maximum(lin(h, weights[2], biases[2]), 0.0)
    ref = lin(h, weights[3], biases[3])

    assert logits.shape == (B, NUM_CLASSES), logits.shape
    assert jnp.allclose(logits, ref, atol=1e-2, rtol=1e-2), \
        float(jnp.max(jnp.abs(logits - ref)))
    print("KERNEL_OK")
</pallas_src>

<mosaic_0001>
module attributes {stable_mosaic.version = 11 : i64} {
  func.func @pc_mlp_kernel(%arg0: i32, %arg1: memref<8x256xbf16, #tpu.memory_space<vmem>>, %arg2: memref<256x512xbf16, #tpu.memory_space<vmem>>, %arg3: memref<1x512xf32, #tpu.memory_space<vmem>>, %arg4: memref<512x128xbf16, #tpu.memory_space<vmem>>, %arg5: memref<1x128xf32, #tpu.memory_space<vmem>>, %arg6: memref<128x128xbf16, #tpu.memory_space<vmem>>, %arg7: memref<1x128xf32, #tpu.memory_space<vmem>>, %arg8: memref<128x128xbf16, #tpu.memory_space<vmem>>, %arg9: memref<1x128xf32, #tpu.memory_space<vmem>>, %arg10: memref<8x128xf32, #tpu.memory_space<vmem>>) attributes {dimension_semantics = [#tpu.dimension_semantics<parallel>], iteration_bounds = array<i64: 2>, scalar_prefetch = 0 : i64, scratch_operands = 0 : i64, tpu.core_type = #tpu.core_type<tc>, window_params = [{transform_indices = @transform_0, window_bounds = array<i64: 8, 256>}, {pipeline_mode = #tpu.pipeline_mode<synchronous>, transform_indices = @transform_1, window_bounds = array<i64: 256, 512>}, {pipeline_mode = #tpu.pipeline_mode<synchronous>, transform_indices = @transform_2, window_bounds = array<i64: 1, 512>}, {pipeline_mode = #tpu.pipeline_mode<synchronous>, transform_indices = @transform_3, window_bounds = array<i64: 512, 128>}, {pipeline_mode = #tpu.pipeline_mode<synchronous>, transform_indices = @transform_4, window_bounds = array<i64: 1, 128>}, {pipeline_mode = #tpu.pipeline_mode<synchronous>, transform_indices = @transform_5, window_bounds = array<i64: 128, 128>}, {pipeline_mode = #tpu.pipeline_mode<synchronous>, transform_indices = @transform_6, window_bounds = array<i64: 1, 128>}, {pipeline_mode = #tpu.pipeline_mode<synchronous>, transform_indices = @transform_7, window_bounds = array<i64: 128, 128>}, {pipeline_mode = #tpu.pipeline_mode<synchronous>, transform_indices = @transform_8, window_bounds = array<i64: 1, 128>}, {transform_indices = @transform_9, window_bounds = array<i64: 8, 128>}]} {
    %c0 = arith.constant 0 : index
    %c0_0 = arith.constant 0 : index
    %0 = vector.load %arg1[%c0, %c0_0] : memref<8x256xbf16, #tpu.memory_space<vmem>>, vector<8x256xbf16>
    %c0_1 = arith.constant 0 : index
    %c0_2 = arith.constant 0 : index
    %1 = vector.load %arg2[%c0_1, %c0_2] : memref<256x512xbf16, #tpu.memory_space<vmem>>, vector<256x512xbf16>
    %cst = arith.constant dense<0.000000e+00> : vector<8x512xf32>
    %2 = tpu.matmul %0, %1, %cst {dimension_numbers = #tpu.dot_dimension_numbers<[1], [0], [0], [1], [0, 0, 1, 1], [], []>} : vector<8x256xbf16>, vector<256x512xbf16>, vector<8x512xf32> -> vector<8x512xf32>
    %c0_3 = arith.constant 0 : index
    %c0_4 = arith.constant 0 : index
    %3 = vector.load %arg3[%c0_3, %c0_4] : memref<1x512xf32, #tpu.memory_space<vmem>>, vector<1x512xf32>
    %4 = vector.broadcast %3 : vector<1x512xf32> to vector<8x512xf32>
    %5 = arith.addf %2, %4 : vector<8x512xf32>
    %cst_5 = arith.constant 0.000000e+00 : f32
    %6 = vector.broadcast %cst_5 : f32 to vector<8x512xf32>
    %7 = arith.maximumf %5, %6 : vector<8x512xf32>
    %8 = arith.truncf %7 : vector<8x512xf32> to vector<8x512xbf16>
    %c0_6 = arith.constant 0 : index
    %c0_7 = arith.constant 0 : index
    %9 = vector.load %arg4[%c0_6, %c0_7] : memref<512x128xbf16, #tpu.memory_space<vmem>>, vector<512x128xbf16>
    %cst_8 = arith.constant dense<0.000000e+00> : vector<8x128xf32>
    %10 = tpu.matmul %8, %9, %cst_8 {dimension_numbers = #tpu.dot_dimension_numbers<[1], [0], [0], [1], [0, 0, 1, 1], [], []>} : vector<8x512xbf16>, vector<512x128xbf16>, vector<8x128xf32> -> vector<8x128xf32>
    %c0_9 = arith.constant 0 : index
    %c0_10 = arith.constant 0 : index
    %11 = vector.load %arg5[%c0_9, %c0_10] : memref<1x128xf32, #tpu.memory_space<vmem>>, vector<1x128xf32>
    %12 = vector.broadcast %11 : vector<1x128xf32> to vector<8x128xf32>
    %13 = arith.addf %10, %12 : vector<8x128xf32>
    %cst_11 = arith.constant 0.000000e+00 : f32
    %14 = vector.broadcast %cst_11 : f32 to vector<8x128xf32>
    %15 = arith.maximumf %13, %14 : vector<8x128xf32>
    %16 = arith.truncf %15 : vector<8x128xf32> to vector<8x128xbf16>
    %c0_12 = arith.constant 0 : index
    %c0_13 = arith.constant 0 : index
    %17 = vector.load %arg6[%c0_12, %c0_13] : memref<128x128xbf16, #tpu.memory_space<vmem>>, vector<128x128xbf16>
    %cst_14 = arith.constant dense<0.000000e+00> : vector<8x128xf32>
    %18 = tpu.matmul %16, %17, %cst_14 {dimension_numbers = #tpu.dot_dimension_numbers<[1], [0], [0], [1], [0, 0, 1, 1], [], []>} : vector<8x128xbf16>, vector<128x128xbf16>, vector<8x128xf32> -> vector<8x128xf32>
    %c0_15 = arith.constant 0 : index
    %c0_16 = arith.constant 0 : index
    %19 = vector.load %arg7[%c0_15, %c0_16] : memref<1x128xf32, #tpu.memory_space<vmem>>, vector<1x128xf32>
    %20 = vector.broadcast %19 : vector<1x128xf32> to vector<8x128xf32>
    %21 = arith.addf %18, %20 : vector<8x128xf32>
    %cst_17 = arith.constant 0.000000e+00 : f32
    %22 = vector.broadcast %cst_17 : f32 to vector<8x128xf32>
    %23 = arith.maximumf %21, %22 : vector<8x128xf32>
    %24 = arith.truncf %23 : vector<8x128xf32> to vector<8x128xbf16>
    %c0_18 = arith.constant 0 : index
    %c0_19 = arith.constant 0 : index
    %25 = vector.load %arg8[%c0_18, %c0_19] : memref<128x128xbf16, #tpu.memory_space<vmem>>, vector<128x128xbf16>
    %cst_20 = arith.constant dense<0.000000e+00> : vector<8x128xf32>
    %26 = tpu.matmul %24, %25, %cst_20 {dimension_numbers = #tpu.dot_dimension_numbers<[1], [0], [0], [1], [0, 0, 1, 1], [], []>} : vector<8x128xbf16>, vector<128x128xbf16>, vector<8x128xf32> -> vector<8x128xf32>
    %c0_21 = arith.constant 0 : index
    %c0_22 = arith.constant 0 : index
    %27 = vector.load %arg9[%c0_21, %c0_22] : memref<1x128xf32, #tpu.memory_space<vmem>>, vector<1x128xf32>
    %28 = vector.broadcast %27 : vector<1x128xf32> to vector<8x128xf32>
    %29 = arith.addf %26, %28 : vector<8x128xf32>
    %c0_23 = arith.constant 0 : index
    %c0_24 = arith.constant 0 : index
    %30 = vector.load %arg10[%c0_23, %c0_24] : memref<8x128xf32, #tpu.memory_space<vmem>>, vector<8x128xf32>
    tpu.vector_store %arg10[%c0_23, %c0_24], %29 {strides = array<i32>} : memref<8x128xf32, #tpu.memory_space<vmem>>, vector<8x128xf32>,
    return
  }
  func.func @transform_0(%arg0: i32) -> (i32, i32) {
    %c0_i32 = arith.constant 0 : i32
    %c0_i32_0 = arith.constant 0 : i32
    return %arg0, %c0_i32 : i32, i32
  }
  func.func @transform_1(%arg0: i32) -> (i32, i32) {
    %c0_i32 = arith.constant 0 : i32
    %c0_i32_0 = arith.constant 0 : i32
    %c0_i32_1 = arith.constant 0 : i32
    return %c0_i32, %c0_i32_0 : i32, i32
  }
  func.func @transform_2(%arg0: i32) -> (i32, i32) {
    %c0_i32 = arith.constant 0 : i32
    %c0_i32_0 = arith.constant 0 : i32
    %c0_i32_1 = arith.constant 0 : i32
    return %c0_i32, %c0_i32_0 : i32, i32
  }
  func.func @transform_3(%arg0: i32) -> (i32, i32) {
    %c0_i32 = arith.constant 0 : i32
    %c0_i32_0 = arith.constant 0 : i32
    %c0_i32_1 = arith.constant 0 : i32
    return %c0_i32, %c0_i32_0 : i32, i32
  }
  func.func @transform_4(%arg0: i32) -> (i32, i32) {
    %c0_i32 = arith.constant 0 : i32
    %c0_i32_0 = arith.constant 0 : i32
    %c0_i32_1 = arith.constant 0 : i32
    return %c0_i32, %c0_i32_0 : i32, i32
  }
  func.func @transform_5(%arg0: i32) -> (i32, i32) {
    %c0_i32 = arith.constant 0 : i32
    %c0_i32_0 = arith.constant 0 : i32
    %c0_i32_1 = arith.constant 0 : i32
    return %c0_i32, %c0_i32_0 : i32, i32
  }
  func.func @transform_6(%arg0: i32) -> (i32, i32) {
    %c0_i32 = arith.constant 0 : i32
    %c0_i32_0 = arith.constant 0 : i32
    %c0_i32_1 = arith.constant 0 : i32
    return %c0_i32, %c0_i32_0 : i32, i32
  }
  func.func @transform_7(%arg0: i32) -> (i32, i32) {
    %c0_i32 = arith.constant 0 : i32
    %c0_i32_0 = arith.constant 0 : i32
    %c0_i32_1 = arith.constant 0 : i32
    return %c0_i32, %c0_i32_0 : i32, i32
  }
  func.func @transform_8(%arg0: i32) -> (i32, i32) {
    %c0_i32 = arith.constant 0 : i32
    %c0_i32_0 = arith.constant 0 : i32
    %c0_i32_1 = arith.constant 0 : i32
    return %c0_i32, %c0_i32_0 : i32, i32
  }
  func.func @transform_9(%arg0: i32) -> (i32, i32) {
    %c0_i32 = arith.constant 0 : i32
    %c0_i32_0 = arith.constant 0 : i32
    return %arg0, %c0_i32 : i32, i32
  }
}

</mosaic_0001>

<bundles_post_ra>
// kernel: tpu_custom_call.1
= control target key start
LH: loop header
LB: loop body
LE: loop exit
PB: predicated region body
PF: predicated region fallthrough
CT: control target
= control target key end

     0   :  { %s2764_s0 = inlined_call_operand.hbm [shape: bf16[16,256], index: 0, kind: input, shape index: {}]   ;;  %s2765_s1 = inlined_call_operand.hbm [shape: bf16[256,512], index: 1, kind: input, shape index: {}]   ;;  %s2766_s2 = inlined_call_operand.hbm [shape: f32[1,512], index: 2, kind: input, shape index: {}]   ;;  %s2767_s3 = inlined_call_operand.hbm [shape: bf16[512,128], index: 3, kind: input, shape index: {}]   ;;  %s2768_s4 = inlined_call_operand.vmem [shape: f32[1,128], index: 4, kind: input, shape index: {}]   ;;  %s2769_s5 = inlined_call_operand.hbm [shape: bf16[128,128], index: 5, kind: input, shape index: {}]   ;;  %s2770_s6 = inlined_call_operand.vmem [shape: f32[1,128], index: 6, kind: input, shape index: {}]   ;;  %s2771_s7 = inlined_call_operand.hbm [shape: bf16[128,128], index: 7, kind: input, shape index: {}]   ;;  %s2772_s8 = inlined_call_operand.vmem [shape: f32[1,128], index: 8, kind: input, shape index: {}]   ;;  %s2773_s9 = inlined_call_operand.hbm [shape: f32[16,128], index: 9, kind: output, shape index: {}]  }
   0x1   :  { %2774 = sst [smem:[#allocation19_spill]] %s2765_s1 }
   0x2   :  { %2775 = sst [smem:[#allocation20_spill]] %s2766_s2 }
   0x3   :  { %2776 = sst [smem:[#allocation21_spill]] %s2767_s3 }
   0x4   :  { %14 = vsyncpa [#allocation3], 0 }
   0x5   :  { %16 = vsyncpa [#allocation3 + $0x1], 0 }
   0x6   :  { %17 = vsyncpa [#allocation6], 0 }
   0x7   :  { %18 = vsyncpa [#allocation9], 0 }
   0x8   :  { %19 = vsyncpa [#allocation12], 0 }
   0x9   :  { %20 = vsyncpa [#allocation4], 0 }
   0xa   :  { %22 = vsyncpa [#allocation4 + $0x1], 0  ;;  %s2566_s30 = smov 0   ;;  %s2568_s10 = smov 0  }
   0xb   :  { %s2570_s11 = smov 0   ;;  %s2572_s12 = smov 0  }
   0xc LB: > { %s2777_s1 = sld [smem:[#allocation19_spill]]  ;;  %s2590_s16 = sadd.s32 4294967295, %s2505_s12   ;;  %s2505_s12 = sphi %s2572_s12, %s2790_s12   ;;  %s2501_s11 = sphi %s2570_s11, %s2789_s11   ;;  %s2497_s10 = sphi %s2568_s10, %s2788_s10   ;;  %s2493_s30 = sphi %s2566_s30, %s2787_s30  }
   0xd   : > { %p1560_p0 = scmp.ge.s32.totalorder %s2505_s12, 1  ;;  %p49_p1 = scmp.eq.s32.totalorder %s2590_s16, 0 }
   0xe   : > { %p253_p2 = scmp.lt.s32.totalorder %s2505_s12, 3  ;;  %s2507_s18 = smov [#allocation5]  }
   0xf   : > { %s266_s19 = sshll.u32 %s2507_s18, 4  ;;  %s2779_s3 = sld [smem:[#allocation21_spill]]  ;;  %s267_s19 = int_to_ptr.vmem [resolvable:$true] %s266_s19 }
  0x10   : > { %p2595_p3 = pnand %p1560_p0, %p253_p2  ;;  %s2508_s24 = smov [#allocation8]  }
  0x11   : > { %s292_s25 = sshll.u32 %s2508_s24, 4  ;;  %s2509_s26 = smov 256   ;;  %s293_s25 = int_to_ptr.vmem [resolvable:$true] %s292_s25 }
  0x12   : > { %s264_s15 = sshll.u32 %s2777_s1, 4  ;;  %p2167_p4 = pneg %p2595_p3  ;;  %s265_s15 = int_to_ptr.hbm [resolvable:$true] %s264_s15 }
  0x13   : > { %s2510_s27 = smov 16   ;;  %s2511_s28 = smov 64  }
  0x14   : > { %p2607_p6 = pnand %p2167_p4, %p49_p1  ;;  %s2512_s29 = smov 4  }
  0x15   : > { %s290_s22 = sshll.u32 %s2779_s3, 4  ;;  %s2781_s2 = sld [smem:[#allocation20_spill]]  ;;  %s291_s22 = int_to_ptr.hbm [resolvable:$true] %s290_s22 }
  0x16   : > { %2170 = dma.hbm_to_vmem [thread:$0]  (!%p2607_p6), %s265_s15, 8192, %s267_s19, [#allocation6], %s2509_s26, %s2509_s26, %s2510_s27  }
  0x17   : > { %2176 = dma.hbm_to_vmem [thread:$0]  (!%p2607_p6), %s291_s22, 4096, %s293_s25, [#allocation9], %s2511_s28, %s2511_s28, %s2512_s29  }
  0x18   : > { %s2513_s20 = smov [#allocation7]   ;;  %s307_s15 = sshll.u32 %s2769_s5, 4  ;;  %s308_s15 = int_to_ptr.hbm [resolvable:$true] %s307_s15 }
  0x19   : > { %s281_s21 = sshll.u32 %s2513_s20, 4  ;;  %s2514_s19 = smov [#allocation10]   ;;  %s282_s21 = int_to_ptr.vmem [resolvable:$true] %s281_s21 }
  0x1a   : > { %s309_s22 = sshll.u32 %s2514_s19, 4  ;;  %s324_s27 = sshll.u32 %s2771_s7, 4  ;;  %s310_s22 = int_to_ptr.vmem [resolvable:$true] %s309_s22  ;;  %s325_s27 = int_to_ptr.hbm [resolvable:$true] %s324_s27 }
  0x1b   : > { %s279_s18 = sshll.u32 %s2781_s2, 4  ;;  %s2515_s1 = smov [#allocation11]   ;;  %s280_s18 = int_to_ptr.hbm [resolvable:$true] %s279_s18 }
  0x1c   : > { %2173 = dma.hbm_to_vmem [thread:$0]  (!%p2607_p6), %s280_s18, 64, %s282_s21, [#allocation6]  }
  0x1d   : > { %2179 = dma.hbm_to_vmem [thread:$0]  (!%p2607_p6), %s308_s15, 1024, %s310_s22, [#allocation9], %s2511_s28, %s2511_s28, %s2512_s29  }
  0x1e   : > { %s326_s13 = sshll.u32 %s2515_s1, 4  ;;  %s1559_s14 = sadd.s32 4294967294, %s2505_s12   ;;  %s327_s13 = int_to_ptr.vmem [resolvable:$true] %s326_s13 }
  0x1f   : > { %2182 = dma.hbm_to_vmem [thread:$0]  (!%p2607_p6), %s325_s27, 1024, %s327_s13, [#allocation12], %s2511_s28, %s2511_s28, %s2512_s29  }
  0x20   : > { %s2632_s18 = sadd.s32 1, %s2505_s12   ;;  %s35_s20 = sadd.s32 1, %s2501_s11 }
  0x21   : > { %s32_s21 = ssub.s32 %s2505_s12, %s2632_s18  ;;  %p42_p7 = scmp.ne.s32.totalorder %s2501_s11, %s2497_s10 }
  0x22   : > { %p33_p8 = scmp.eq.s32.totalorder %s32_s21, 0  ;;  %p43_p9 = scmp.eq.s32.totalorder %s2505_s12, 0 }
  0x23   : > { %p48_p10 = scmp.ne.s32.totalorder %s2497_s10, %s2493_s30  ;;  %p240_p11 = scmp.eq.s32.totalorder %s2590_s16, 1 }
  0x24   : > { %s2644_s24 = scalar_select %p33_p8, %s2501_s11, %s35_s20  }
  0x25   : > { %p2648_p12 = por %p49_p1, %p48_p10  ;;  %p2652_p13 = por %p240_p11, %p42_p7 }
  0x26   : > { %p246_p0 = scmp.eq.s32.totalorder %s1559_s14, 1  ;;  %p44_p2 = por %p43_p9, %p42_p7 }
  0x27   : > { %s343_s29 = sand.u32 1, %s2501_s11   ;;  %p2196_p6 = scmp.lt.s32.totalorder %s2505_s12, 2 }
  0x28   : > { %p2657_p4 = por %p246_p0, %p48_p10  ;;  %s1567_s19 = sshll.u32 %s343_s29, 3 }
  0x29   : > { %s2030_s22 = sshll.u32 %s2505_s12, 3  ;;  %s347_s13 = scalar_lea.vmem [#allocation2], %s1567_s19 }
  0x2a   : > { %s352_s27 = scalar_lea.hbm %s2764_s0, %s2030_s22  ;;  %s356_s20 = sshll.u32 %s347_s13, 4  ;;  %s357_s20 = int_to_ptr.vmem [resolvable:$true] %s356_s20 }
  0x2b   : > { %s354_s1 = sshll.u32 %s352_s27, 4  ;;  %p2666_p8 = pnand %p2196_p6, %p44_p2  ;;  %s355_s1 = int_to_ptr.hbm [resolvable:$true] %s354_s1 }
  0x2c   : > { %s344_s21 = scalar_lea.sflag [#allocation3], %s343_s29  ;;  %s2397_s2 = sshra.s32 %s355_s1, 4  ;;  %s2398_s2 = int_to_ptr.hbm [resolvable:$true] %s2397_s2 }
  0x2d   : > { %s2399_s3 = scalar_lea.hbm %s2398_s2, 8  ;;  %p2401_p9 = pneg %p2666_p8 }
  0x2e   : > { %p2400_p7 = scmp.ne.s32.totalorder %s2398_s2, %s2399_s3  ;;  %s2404_s19 = scalar_lea.hbm %s2764_s0, 16 }
  0x2f   : > { %p2405_p0 = scmp.lt.s32.totalorder %s2398_s2, %s2764_s0  ;;  %p2406_p2 = scmp.lt.s32.totalorder %s2404_s19, %s2399_s3 }
  0x30   : > { %p2402_p10 = pnand %p2401_p9, %p2400_p7 }
  0x31   : > { %p2407_p6 = por %p2406_p2, %p2405_p0 }
  0x32   : > { %p2403_p11 = pneg %p2402_p10 }
  0x34   : > { %p2408_p5 = pnand %p2407_p6, %p2403_p11 }
  0x36   : > { %2411 = shalt.err (!%p2408_p5)
}
  0x37   : > { %2186 = dma.hbm_to_vmem [thread:$0]  (!%p2666_p8), %s355_s1, 128, %s357_s20, %s344_s21  }
  0x38   : > { %365 = sbr.rel (%p2595_p3) target bundleno = 680 (0x2a8), region = 56  ;;  %s2683_s29 = sand.u32 (!%p2595_p3), 1, %s2497_s10  }
  0x39   : > { %s1571_s13 = sshll.u32 (!%p2595_p3), %s2683_s29, 3  ;;  %s368_s22 = scalar_lea.sflag (!%p2595_p3), [#allocation3], %s2683_s29 }
  0x3a   : > { %s2689_s2 = scalar_lea.vmem (!%p2595_p3), [#allocation2], %s1571_s13 }
  0x3d   : > { %2472 = dma.done.wait (%p2648_p12), %s368_s22, 128  }
  0x3e   : > { %2474 = vsyncadd (%p2648_p12), %s368_s22, 4294967168 }
  0x3f   : > { %2476 = dma.done.wait (%p49_p1), [#allocation6], 8256  }
  0x40   : > { %2478 = vsyncadd (%p49_p1), [#allocation6], 4294959040 }
  0x41   : > { %2480 = dma.done.wait (%p49_p1), [#allocation9], 5120  }
  0x42   : > { %2482 = vsyncadd (%p49_p1), [#allocation9], 4294962176 }
  0x43   : > { %2484 = dma.done.wait (%p49_p1), [#allocation12], 1024  }
  0x44   : > { %2486 = vsyncadd (%p49_p1), [#allocation12], 4294966272  ;;  %v1692_v0 = vld [vmem:[#allocation5 + $0xe0] sm:$0xf]  ;;  %v2061_v1 = vld [vmem:[#allocation5 + $0xec] sm:$0xf0] }
  0x45   : > { %v1820_v2 = vld [vmem:[#allocation5 + $0x1e0] sm:$0xf]  ;;  %v1693_v3 = vor.u32 %v2061_v1, %v1692_v0  ;;  %v2093_v4 = vld [vmem:[#allocation5 + $0x1ec] sm:$0xf0]  ;;  %v2059_v5 = vld [vmem:[#allocation5 + $0xe4] sm:$0xf] }
  0x46   : > { %v1694_v6 = vld [vmem:[#allocation5 + $0xf0] sm:$0xf0]  ;;  %v1821_v7 = vor.u32 %v2093_v4, %v1820_v2  ;;  %v2091_v9 = vld [vmem:[#allocation5 + $0x1e4] sm:$0xf]  ;;  %v1676_v11 = vld [vmem:[#allocation5 + $0xc0] sm:$0xf] }
  0x47   : > { %v1697_v8 = vor.u32 %v2059_v5, %v1694_v6  ;;  %v1822_v10 = vld [vmem:[#allocation5 + $0x1f0] sm:$0xf0]  ;;  %834 = vmatpush.bf16.msra.mxu0 %v1693_v3  ;;  %v2057_v13 = vld [vmem:[#allocation5 + $0xcc] sm:$0xf0]  ;;  %v1804_v14 = vld [vmem:[#allocation5 + $0x1c0] sm:$0xf] }
  0x48   : > { %v1825_v12 = vor.u32 %v2091_v9, %v1822_v10  ;;  %v2089_v15 = vld [vmem:[#allocation5 + $0x1cc] sm:$0xf0]  ;;  %847 = vmatpush.bf16.msra.mxu1 %v1821_v7  ;;  %v1677_v16 = vor.u32 %v2057_v13, %v1676_v11  ;;  %v2055_v18 = vld [vmem:[#allocation5 + $0xc4] sm:$0xf]  ;;  %v1678_v19 = vld [vmem:[#allocation5 + $0xd0] sm:$0xf0] }
  0x49   : > { %860 = vmatpush.bf16.msra.mxu2 %v1697_v8  ;;  %v1805_v17 = vor.u32 %v2089_v15, %v1804_v14  ;;  %v2087_v20 = vld [vmem:[#allocation5 + $0x1c4] sm:$0xf]  ;;  %v1681_v21 = vor.u32 %v2055_v18, %v1678_v19  ;;  %v1806_v22 = vld [vmem:[#allocation5 + $0x1d0] sm:$0xf0]  ;;  %v1660_v23 = vld [vmem:[#allocation5 + $0xa0] sm:$0xf] }
  0x4a   : > { %873 = vmatpush.bf16.msra.mxu3 %v1825_v12  ;;  %v2053_v24 = vld [vmem:[#allocation5 + $0xac] sm:$0xf0]  ;;  %v1809_v25 = vor.u32 %v2087_v20, %v1806_v22  ;;  %v1788_v26 = vld [vmem:[#allocation5 + $0x1a0] sm:$0xf]  ;;  %v2051_v28 = vld [vmem:[#allocation5 + $0xa4] sm:$0xf] }
  0x4b   : > { %v2085_v27 = vld [vmem:[#allocation5 + $0x1ac] sm:$0xf0]  ;;  %835 = vmatpush.bf16.msra.mxu0 %v1677_v16  ;;  %v1661_v29 = vor.u32 %v2053_v24, %v1660_v23  ;;  %v1662_v30 = vld [vmem:[#allocation5 + $0xb0] sm:$0xf0]  ;;  %v2083_v31 = vld [vmem:[#allocation5 + $0x1a4] sm:$0xf] }
  0x4c   : > { %v1790_v32 = vld [vmem:[#allocation5 + $0x1b0] sm:$0xf0]  ;;  %848 = vmatpush.bf16.msra.mxu1 %v1805_v17  ;;  %v1789_v33 = vor.u32 %v2085_v27, %v1788_v26  ;;  %v1665_v34 = vor.u32 %v2051_v28, %v1662_v30  ;;  %v1644_v35 = vld [vmem:[#allocation5 + $0x80] sm:$0xf]  ;;  %v2049_v36 = vld [vmem:[#allocation5 + $0x8c] sm:$0xf0] }
  0x4d   : > { %861 = vmatpush.bf16.msra.mxu2 %v1681_v21  ;;  %v1772_v37 = vld [vmem:[#allocation5 + $0x180] sm:$0xf]  ;;  %v1793_v38 = vor.u32 %v2083_v31, %v1790_v32  ;;  %v2081_v39 = vld [vmem:[#allocation5 + $0x18c] sm:$0xf0]  ;;  %v2047_v40 = vld [vmem:[#allocation5 + $0x84] sm:$0xf]  ;;  %v1645_v44 = vor.u32 %v2049_v36, %v1644_v35 }
  0x4e   : > { %874 = vmatpush.bf16.msra.mxu3 %v1809_v25  ;;  %v1646_v41 = vld [vmem:[#allocation5 + $0x90] sm:$0xf0]  ;;  %v2079_v42 = vld [vmem:[#allocation5 + $0x184] sm:$0xf]  ;;  %v1773_v45 = vor.u32 %v2081_v39, %v1772_v37  ;;  %v1628_v47 = vld [vmem:[#allocation5 + $0x60] sm:$0xf] }
  0x4f   : > { %v1774_v43 = vld [vmem:[#allocation5 + $0x190] sm:$0xf0]  ;;  %836 = vmatpush.bf16.msra.mxu0 %v1661_v29  ;;  %v1649_v46 = vor.u32 %v2047_v40, %v1646_v41  ;;  %v2045_v48 = vld [vmem:[#allocation5 + $0x6c] sm:$0xf0]  ;;  %v1756_v49 = vld [vmem:[#allocation5 + $0x160] sm:$0xf] }
  0x50   : > { %849 = vmatpush.bf16.msra.mxu1 %v1789_v33  ;;  %v1777_v50 = vor.u32 %v2079_v42, %v1774_v43  ;;  %v2077_v51 = vld [vmem:[#allocation5 + $0x16c] sm:$0xf0]  ;;  %v2043_v52 = vld [vmem:[#allocation5 + $0x64] sm:$0xf]  ;;  %v1630_v53 = vld [vmem:[#allocation5 + $0x70] sm:$0xf0]  ;;  %v1629_v56 = vor.u32 %v2045_v48, %v1628_v47 }
  0x51   : > { %862 = vmatpush.bf16.msra.mxu2 %v1665_v34  ;;  %v2075_v54 = vld [vmem:[#allocation5 + $0x164] sm:$0xf]  ;;  %v1758_v55 = vld [vmem:[#allocation5 + $0x170] sm:$0xf0]  ;;  %v1757_v57 = vor.u32 %v2077_v51, %v1756_v49  ;;  %v1633_v58 = vor.u32 %v2043_v52, %v1630_v53  ;;  %v1612_v59 = vld [vmem:[#allocation5 + $0x40] sm:$0xf] }
  0x52   : > { %875 = vmatpush.bf16.msra.mxu3 %v1793_v38  ;;  %v2041_v60 = vld [vmem:[#allocation5 + $0x4c] sm:$0xf0]  ;;  %v1740_v61 = vld [vmem:[#allocation5 + $0x140] sm:$0xf]  ;;  %v1761_v62 = vor.u32 %v2075_v54, %v1758_v55  ;;  %v2039_v0 = vld [vmem:[#allocation5 + $0x44] sm:$0xf] }
  0x53   : > { %837 = vmatpush.bf16.msra.mxu0 %v1645_v44  ;;  %v2073_v63 = vld [vmem:[#allocation5 + $0x14c] sm:$0xf0]  ;;  %v1614_v1 = vld [vmem:[#allocation5 + $0x50] sm:$0xf0]  ;;  %v2071_v2 = vld [vmem:[#allocation5 + $0x144] sm:$0xf]  ;;  %v1613_v4 = vor.u32 %v2041_v60, %v1612_v59 }
  0x54   : > { %850 = vmatpush.bf16.msra.mxu1 %v1773_v45  ;;  %v1742_v3 = vld [vmem:[#allocation5 + $0x150] sm:$0xf0]  ;;  %v1741_v5 = vor.u32 %v2073_v63, %v1740_v61  ;;  %v1617_v6 = vor.u32 %v2039_v0, %v1614_v1  ;;  %v1596_v7 = vld [vmem:[#allocation5 + $0x20] sm:$0xf]  ;;  %v2037_v8 = vld [vmem:[#allocation5 + $0x2c] sm:$0xf0] }
  0x55   : > { %863 = vmatpush.bf16.msra.mxu2 %v1649_v46  ;;  %v1724_v9 = vld [vmem:[#allocation5 + $0x120] sm:$0xf]  ;;  %v1745_v10 = vor.u32 %v2071_v2, %v1742_v3  ;;  %v2069_v11 = vld [vmem:[#allocation5 + $0x12c] sm:$0xf0]  ;;  %v2035_v12 = vld [vmem:[#allocation5 + $0x24] sm:$0xf]  ;;  %v1597_v16 = vor.u32 %v2037_v8, %v1596_v7 }
  0x56   : > { %876 = vmatpush.bf16.msra.mxu3 %v1777_v50  ;;  %v1598_v13 = vld [vmem:[#allocation5 + $0x30] sm:$0xf0]  ;;  %v2067_v14 = vld [vmem:[#allocation5 + $0x124] sm:$0xf]  ;;  %v1580_v17 = vld [vmem:[#allocation5] sm:$0xf]  ;;  %v1725_v20 = vor.u32 %v2069_v11, %v1724_v9 }
  0x57   : > { %838 = vmatpush.bf16.msra.mxu0 %v1629_v56  ;;  %v1726_v15 = vld [vmem:[#allocation5 + $0x130] sm:$0xf0]  ;;  %v2033_v18 = vld [vmem:[#allocation5 + $0xc] sm:$0xf0]  ;;  %v1708_v19 = vld [vmem:[#allocation5 + $0x100] sm:$0xf]  ;;  %v1601_v21 = vor.u32 %v2035_v12, %v1598_v13 }
  0x58   : > { %851 = vmatpush.bf16.msra.mxu1 %v1757_v57  ;;  %v2065_v22 = vld [vmem:[#allocation5 + $0x10c] sm:$0xf0]  ;;  %v2031_v23 = vld [vmem:[#allocation5 + $0x4] sm:$0xf]  ;;  %v1582_v24 = vld [vmem:[#allocation5 + $0x10] sm:$0xf0]  ;;  %v1729_v25 = vor.u32 %v2067_v14, %v1726_v15  ;;  %v1581_v32 = vor.u32 %v2033_v18, %v1580_v17 }
  0x59   : > { %864 = vmatpush.bf16.msra.mxu2 %v1633_v58  ;;  %v2063_v26 = vld [vmem:[#allocation5 + $0x104] sm:$0xf]  ;;  %v1710_v27 = vld [vmem:[#allocation5 + $0x110] sm:$0xf0]  ;;  %v1700_v28 = vld [vmem:[#allocation5 + $0xe8] sm:$0xf]  ;;  %v1709_v37 = vor.u32 %v2065_v22, %v1708_v19  ;;  %v1585_v38 = vor.u32 %v2031_v23, %v1582_v24 }
  0x5a   : > { %877 = vmatpush.bf16.msra.mxu3 %v1761_v62  ;;  %v2062_v29 = vld [vmem:[#allocation5 + $0xf4] sm:$0xf0]  ;;  %v1828_v30 = vld [vmem:[#allocation5 + $0x1e8] sm:$0xf]  ;;  %v2060_v34 = vld [vmem:[#allocation5 + $0xec] sm:$0xf]  ;;  %v1713_v42 = vor.u32 %v2063_v26, %v1710_v27 }
  0x5b   : > { %839 = vmatpush.bf16.msra.mxu0 %v1613_v4  ;;  %v432_v31 = vld [vmem:[%s2689_s2] sm:$0xff]  ;;  %v2092_v39 = vld [vmem:[#allocation5 + $0x1ec] sm:$0xf]  ;;  %v1701_v43 = vor.u32 %v2062_v29, %v1700_v28  ;;  %v1684_v46 = vld [vmem:[#allocation5 + $0xc8] sm:$0xf]  ;;  %s2027_s20 = sshll.u32 %s2590_s16, 3 }
  0x5c   : > { %852 = vmatpush.bf16.msra.mxu1 %v1741_v5  ;;  %v2094_v33 = vld [vmem:[#allocation5 + $0x1f4] sm:$0xf0]  ;;  %v1702_v35 = vld [vmem:[#allocation5 + $0xf8] sm:$0xf0]  ;;  %v508_v36 = vunpack.c.l.b16 %v432_v31  ;;  %v509_v41 = vunpack.c.h.b16 %v432_v31  ;;  %v1812_v48 = vld [vmem:[#allocation5 + $0x1c8] sm:$0xf]  ;;  %s1436_s25 = scalar_lea.hbm %s2773_s9, %s2027_s20 }
  0x5d   : > { %865 = vmatpush.bf16.msra.mxu2 %v1617_v6  ;;  %v1830_v40 = vld [vmem:[#allocation5 + $0x1f8] sm:$0xf0]  ;;  %v1829_v44 = vor.u32 %v2094_v33, %v1828_v30  ;;  %v1705_v45 = vor.u32 %v2060_v34, %v1702_v35  ;;  %v2058_v47 = vld [vmem:[#allocation5 + $0xd4] sm:$0xf0]  ;;  %v2056_v51 = vld [vmem:[#allocation5 + $0xcc] sm:$0xf] }
  0x5e   : > { %878 = vmatpush.bf16.msra.mxu3 %v1745_v10  ;;  %v1833_v49 = vor.u32 %v2092_v39, %v1830_v40  ;;  %v2090_v50 = vld [vmem:[#allocation5 + $0x1d4] sm:$0xf0]  ;;  %v1686_v52 = vld [vmem:[#allocation5 + $0xd8] sm:$0xf0]  ;;  %v2708_v53 = vpack.c.b16 %v508_v36, %v508_v36  ;;  %v2088_v54 = vld [vmem:[#allocation5 + $0x1cc] sm:$0xf]  ;;  %v2710_v56 = vpack.c.b16 %v509_v41, %v509_v41  ;;  %v1685_v57 = vor.u32 %v2058_v47, %v1684_v46 }
  0x5f   : > { %840 = vmatpush.bf16.msra.mxu0 %v1597_v16  ;;  %v1814_v55 = vld [vmem:[#allocation5 + $0x1d8] sm:$0xf0]  ;;  %v1813_v58 = vor.u32 %v2090_v50, %v1812_v48  ;;  %v1689_v59 = vor.u32 %v2056_v51, %v1686_v52  ;;  %v1668_v60 = vld [vmem:[#allocation5 + $0xa8] sm:$0xf]  ;;  %v2054_v61 = vld [vmem:[#allocation5 + $0xb4] sm:$0xf0] }
  0x60   : > { %853 = vmatpush.bf16.msra.mxu1 %v1725_v20  ;;  %v1796_v62 = vld [vmem:[#allocation5 + $0x1a8] sm:$0xf]  ;;  %v1817_v63 = vor.u32 %v2088_v54, %v1814_v55  ;;  %v2086_v0 = vld [vmem:[#allocation5 + $0x1b4] sm:$0xf0]  ;;  %v2052_v1 = vld [vmem:[#allocation5 + $0xac] sm:$0xf]  ;;  %v1669_v5 = vor.u32 %v2054_v61, %v1668_v60 }
  0x61   : > { %866 = vmatpush.bf16.msra.mxu2 %v1601_v21  ;;  %v1670_v2 = vld [vmem:[#allocation5 + $0xb8] sm:$0xf0]  ;;  %v2084_v3 = vld [vmem:[#allocation5 + $0x1ac] sm:$0xf]  ;;  %v1797_v6 = vor.u32 %v2086_v0, %v1796_v62  ;;  %v1652_v8 = vld [vmem:[#allocation5 + $0x88] sm:$0xf] }
  0x62   : > { %879 = vmatpush.bf16.msra.mxu3 %v1729_v25  ;;  %v1798_v4 = vld [vmem:[#allocation5 + $0x1b8] sm:$0xf0]  ;;  %v1673_v7 = vor.u32 %v2052_v1, %v1670_v2  ;;  %v2050_v9 = vld [vmem:[#allocation5 + $0x94] sm:$0xf0]  ;;  %v1780_v10 = vld [vmem:[#allocation5 + $0x188] sm:$0xf] }
  0x63   : > { %841 = vmatpush.bf16.msra.mxu0 %v1581_v32  ;;  %v1801_v11 = vor.u32 %v2084_v3, %v1798_v4  ;;  %v2082_v12 = vld [vmem:[#allocation5 + $0x194] sm:$0xf0]  ;;  %v2048_v13 = vld [vmem:[#allocation5 + $0x8c] sm:$0xf]  ;;  %v1654_v14 = vld [vmem:[#allocation5 + $0x98] sm:$0xf0]  ;;  %v1653_v17 = vor.u32 %v2050_v9, %v1652_v8 }
  0x64   : > { %854 = vmatpush.bf16.msra.mxu1 %v1709_v37  ;;  %v2080_v15 = vld [vmem:[#allocation5 + $0x18c] sm:$0xf]  ;;  %v1782_v16 = vld [vmem:[#allocation5 + $0x198] sm:$0xf0]  ;;  %v1781_v18 = vor.u32 %v2082_v12, %v1780_v10  ;;  %v1657_v19 = vor.u32 %v2048_v13, %v1654_v14  ;;  %v1636_v20 = vld [vmem:[#allocation5 + $0x68] sm:$0xf] }
  0x65   : > { %867 = vmatpush.bf16.msra.mxu2 %v1585_v38  ;;  %v2046_v21 = vld [vmem:[#allocation5 + $0x74] sm:$0xf0]  ;;  %v1764_v22 = vld [vmem:[#allocation5 + $0x168] sm:$0xf]  ;;  %v1785_v23 = vor.u32 %v2080_v15, %v1782_v16  ;;  %v2044_v25 = vld [vmem:[#allocation5 + $0x6c] sm:$0xf] }
  0x66   : > { %880 = vmatpush.bf16.msra.mxu3 %v1713_v42  ;;  %842 = vmatmul.bf16.vlgmr.msra.gmra.mxu0 %v2708_v53  ;;  %v2078_v24 = vld [vmem:[#allocation5 + $0x174] sm:$0xf0]  ;;  %v1638_v26 = vld [vmem:[#allocation5 + $0x78] sm:$0xf0]  ;;  %v2076_v27 = vld [vmem:[#allocation5 + $0x16c] sm:$0xf]  ;;  %v1637_v29 = vor.u32 %v2046_v21, %v1636_v20 }
  0x67   : > { %886 = vmatpush.bf16.msrb.mxu0 %v1701_v43  ;;  %855 = vmatmul.bf16.vlgmr.msra.gmra.mxu1 %v2710_v56  ;;  %v1766_v28 = vld [vmem:[#allocation5 + $0x178] sm:$0xf0]  ;;  %v1620_v30 = vld [vmem:[#allocation5 + $0x48] sm:$0xf]  ;;  %v2042_v31 = vld [vmem:[#allocation5 + $0x54] sm:$0xf0]  ;;  %v1765_v33 = vor.u32 %v2078_v24, %v1764_v22  ;;  %v1641_v34 = vor.u32 %v2044_v25, %v1638_v26 }
  0x68   : > { %899 = vmatpush.bf16.msrb.mxu1 %v1829_v44  ;;  %868 = vmatmul.bf16.vlgmr.msra.gmra.mxu2 %v2708_v53  ;;  %v1748_v32 = vld [vmem:[#allocation5 + $0x148] sm:$0xf]  ;;  %v1769_v35 = vor.u32 %v2076_v27, %v1766_v28  ;;  %v2074_v36 = vld [vmem:[#allocation5 + $0x154] sm:$0xf0]  ;;  %v2040_v37 = vld [vmem:[#allocation5 + $0x4c] sm:$0xf]  ;;  %v1621_v41 = vor.u32 %v2042_v31, %v1620_v30 }
  0x69   : > { %912 = vmatpush.bf16.msrb.mxu2 %v1705_v45  ;;  %881 = vmatmul.bf16.vlgmr.msra.gmra.mxu3 %v2710_v56  ;;  %v1622_v38 = vld [vmem:[#allocation5 + $0x58] sm:$0xf0]  ;;  %v2072_v39 = vld [vmem:[#allocation5 + $0x14c] sm:$0xf]  ;;  %v1749_v42 = vor.u32 %v2074_v36, %v1748_v32  ;;  %v1604_v44 = vld [vmem:[#allocation5 + $0x28] sm:$0xf] }
  0x6a   : > { %925 = vmatpush.bf16.msrb.mxu3 %v1833_v49  ;;  %v1750_v40 = vld [vmem:[#allocation5 + $0x158] sm:$0xf0]  ;;  %v1625_v43 = vor.u32 %v2040_v37, %v1622_v38  ;;  %v2038_v45 = vld [vmem:[#allocation5 + $0x34] sm:$0xf0]  ;;  %v1732_v46 = vld [vmem:[#allocation5 + $0x128] sm:$0xf] }
  0x6b   : > { %887 = vmatpush.bf16.msrb.mxu0 %v1685_v57  ;;  %v1753_v47 = vor.u32 %v2072_v39, %v1750_v40  ;;  %v2070_v48 = vld [vmem:[#allocation5 + $0x134] sm:$0xf0]  ;;  %v2036_v49 = vld [vmem:[#allocation5 + $0x2c] sm:$0xf]  ;;  %v1606_v50 = vld [vmem:[#allocation5 + $0x38] sm:$0xf0]  ;;  %v1605_v54 = vor.u32 %v2038_v45, %v1604_v44 }
  0x6c   : > { %900 = vmatpush.bf16.msrb.mxu1 %v1813_v58  ;;  %v2068_v51 = vld [vmem:[#allocation5 + $0x12c] sm:$0xf]  ;;  %v1734_v52 = vld [vmem:[#allocation5 + $0x138] sm:$0xf0]  ;;  %v1733_v55 = vor.u32 %v2070_v48, %v1732_v46  ;;  %v1609_v57 = vor.u32 %v2036_v49, %v1606_v50  ;;  %v1588_v58 = vld [vmem:[#allocation5 + $0x8] sm:$0xf] }
  0x6d   : > { %913 = vmatpush.bf16.msrb.mxu2 %v1689_v59  ;;  %v2034_v59 = vld [vmem:[#allocation5 + $0x14] sm:$0xf0]  ;;  %v1716_v60 = vld [vmem:[#allocation5 + $0x108] sm:$0xf]  ;;  %v1737_v61 = vor.u32 %v2068_v51, %v1734_v52  ;;  %v1590_v0 = vld [vmem:[#allocation5 + $0x18] sm:$0xf0] }
  0x6e   : > { %926 = vmatpush.bf16.msrb.mxu3 %v1817_v63  ;;  %v2066_v62 = vld [vmem:[#allocation5 + $0x114] sm:$0xf0]  ;;  %v2032_v63 = vld [vmem:[#allocation5 + $0xc] sm:$0xf]  ;;  %v1718_v2 = vld [vmem:[#allocation5 + $0x118] sm:$0xf0]  ;;  %v1589_v3 = vor.u32 %v2034_v59, %v1588_v58 }
  0x6f   : > { %888 = vmatpush.bf16.msrb.mxu0 %v1669_v5  ;;  %v2064_v1 = vld [vmem:[#allocation5 + $0x10c] sm:$0xf]  ;;  %v1717_v4 = vor.u32 %v2066_v62, %v1716_v60  ;;  %v1593_v5 = vor.u32 %v2032_v63, %v1590_v0  ;;  %v2110_v8 = vld [vmem:[#allocation8 + $0x78] sm:$0xff]  ;;  %v2101_v10 = vld [vmem:[#allocation8 + $0x30] sm:$0xff]  ;;  %s431_s27 = scalar_lea.vmem [#allocation13], %s1571_s13  ;;  %s1440_s2 = sshll.u32 %s1436_s25, 4  ;;  %s1441_s2 = int_to_ptr.hbm [resolvable:$true] %s1440_s2 }
  0x70   : > { %901 = vmatpush.bf16.msrb.mxu1 %v1797_v6  ;;  %v1721_v6 = vor.u32 %v2064_v1, %v1718_v2  ;;  %v2118_v9 = vld [vmem:[#allocation8 + $0xb8] sm:$0xff]  ;;  %v2100_v12 = vld [vmem:[#allocation8 + $0x28] sm:$0xff]  ;;  %v2099_v14 = vld [vmem:[#allocation8 + $0x20] sm:$0xff]  ;;  %s1438_s22 = sshll.u32 %s431_s27, 4  ;;  %s1426_s3 = scalar_lea.sflag [#allocation4], %s2683_s29  ;;  %s1439_s22 = int_to_ptr.vmem [resolvable:$true] %s1438_s22 }
  0x71   : > { %914 = vmatpush.bf16.msrb.mxu2 %v1673_v7  ;;  %v2102_v7 = vld [vmem:[#allocation8 + $0x38] sm:$0xff]  ;;  %v2108_v13 = vld [vmem:[#allocation8 + $0x68] sm:$0xff]  ;;  %v2107_v15 = vld [vmem:[#allocation8 + $0x60] sm:$0xff]  ;;  %s2441_s16 = sshra.s32 %s1441_s2, 4  ;;  %s2447_s20 = scalar_lea.hbm %s2773_s9, 16  ;;  %s2442_s16 = int_to_ptr.hbm [resolvable:$true] %s2441_s16 }
  0x72   : > { %927 = vmatpush.bf16.msrb.mxu3 %v1801_v11  ;;  %v2109_v11 = vld [vmem:[#allocation8 + $0x70] sm:$0xff]  ;;  %v2098_v16 = vld [vmem:[#allocation8 + $0x18] sm:$0xff]  ;;  %v2104_v20 = vld [vmem:[#allocation8 + $0x48] sm:$0xff]  ;;  %s2443_s17 = scalar_lea.hbm %s2442_s16, 8  ;;  %p2448_p12 = scmp.lt.s32.totalorder %s2442_s16, %s2773_s9 }
  0x73   : > { %889 = vmatpush.bf16.msrb.mxu0 %v1653_v17  ;;  %v2106_v17 = vld [vmem:[#allocation8 + $0x58] sm:$0xff]  ;;  %v2095_v22 = vld [vmem:[#allocation8] sm:$0xff]  ;;  %v2125_v25 = vld [vmem:[#allocation8 + $0xf0] sm:$0xff]  ;;  %p2444_p1 = scmp.ne.s32.totalorder %s2442_s16, %s2443_s17  ;;  %p2449_p8 = scmp.lt.s32.totalorder %s2447_s20, %s2443_s17 }
  0x74   : > { %902 = vmatpush.bf16.msrb.mxu1 %v1781_v18  ;;  %v2097_v18 = vld [vmem:[#allocation8 + $0x10] sm:$0xff]  ;;  %v2126_v21 = vld [vmem:[#allocation8 + $0xf8] sm:$0xff]  ;;  %v2103_v24 = vld [vmem:[#allocation8 + $0x40] sm:$0xff] }
  0x75   : > { %915 = vmatpush.bf16.msrb.mxu2 %v1657_v19  ;;  %v2117_v19 = vld [vmem:[#allocation8 + $0xb0] sm:$0xff]  ;;  %v2115_v26 = vld [vmem:[#allocation8 + $0xa0] sm:$0xff]  ;;  %v2124_v27 = vld [vmem:[#allocation8 + $0xe8] sm:$0xff]  ;;  %p2445_p3 = pnand %p2444_p1, %p2652_p13  ;;  %p2450_p7 = por %p2449_p8, %p2448_p12 }
  0x76   : > { %928 = vmatpush.bf16.msrb.mxu3 %v1785_v23  ;;  %v2116_v23 = vld [vmem:[#allocation8 + $0xa8] sm:$0xff]  ;;  %v2114_v28 = vld [vmem:[#allocation8 + $0x98] sm:$0xff]  ;;  %v2113_v30 = vld [vmem:[#allocation8 + $0x90] sm:$0xff] }
  0x77   : > { %890 = vmatpush.bf16.msrb.mxu0 %v1637_v29  ;;  %v2123_v29 = vld [vmem:[#allocation8 + $0xe0] sm:$0xff]  ;;  %v497_v31 = vld [vmem:[#allocation7] sm:$0xf]  ;;  %v2121_v36 = vld [vmem:[#allocation8 + $0xd0] sm:$0xff]  ;;  %p2446_p5 = pneg %p2445_p3 }
  0x78   : > { %903 = vmatpush.bf16.msrb.mxu1 %v1765_v33  ;;  %v2122_v32 = vld [vmem:[#allocation8 + $0xd8] sm:$0xff]  ;;  %v499_v33 = vperm.slane %v497_v31, 0  ;;  %v500_v39 = vperm.slane %v497_v31, 1  ;;  %v2111_v40 = vld [vmem:[#allocation8 + $0x80] sm:$0xff]  ;;  %v501_v58 = vperm.slane %v497_v31, 2  ;;  %v502_v63 = vperm.slane %v497_v31, 3 }
  0x79   : > { %916 = vmatpush.bf16.msrb.mxu2 %v1641_v34  ;;  %v2112_v34 = vld [vmem:[#allocation8 + $0x88] sm:$0xff]  ;;  %v2119_v50 = vld [vmem:[#allocation8 + $0xc0] sm:$0xff]  ;;  %p2451_p9 = pnand %p2450_p7, %p2446_p5 }
  0x7a   : > { %929 = vmatpush.bf16.msrb.mxu3 %v1769_v35 }
  0x7b   : > { %891 = vmatpush.bf16.msrb.mxu0 %v1621_v41 }
  0x7c   : > { %904 = vmatpush.bf16.msrb.mxu1 %v1749_v42  ;;  %v2120_v42 = vld [vmem:[#allocation8 + $0xc8] sm:$0xff] }
  0x7d   : > { %917 = vmatpush.bf16.msrb.mxu2 %v1625_v43 }
  0x7e   : > { %930 = vmatpush.bf16.msrb.mxu3 %v1753_v47 }
  0x7f   : > { %892 = vmatpush.bf16.msrb.mxu0 %v1605_v54 }
  0x80   : > { %905 = vmatpush.bf16.msrb.mxu1 %v1733_v55 }
  0x81   : > { %918 = vmatpush.bf16.msrb.mxu2 %v1609_v57 }
  0x82   : > { %931 = vmatpush.bf16.msrb.mxu3 %v1737_v61 }
  0x83   : > { %893 = vmatpush.bf16.msrb.mxu0 %v1589_v3 }
  0x84   : > { %906 = vmatpush.bf16.msrb.mxu1 %v1717_v4 }
  0x85   : > { %919 = vmatpush.bf16.msrb.mxu2 %v1593_v5 }
  0x86   : > { %932 = vmatpush.bf16.msrb.mxu3 %v1721_v6  ;;  %894 = vmatmul.bf16.vlgmr.msrb.gmra.mxu0 %v2708_v53 }
  0x87   : > { %1206 = vmatpush.bf16.msra.mxu0 %v2102_v7  ;;  %907 = vmatmul.bf16.vlgmr.msrb.gmra.mxu1 %v2710_v56 }
  0x88   : > { %1219 = vmatpush.bf16.msra.mxu1 %v2110_v8  ;;  %920 = vmatmul.bf16.vlgmr.msrb.gmra.mxu2 %v2708_v53  ;;  %v2105_v53 = vld [vmem:[#allocation8 + $0x50] sm:$0xff] }
  0x89   : > { %933 = vmatmul.bf16.vlgmr.msrb.gmra.mxu3 %v2710_v56  ;;  %1232 = vmatpush.bf16.msra.mxu2 %v2118_v9  ;;  %v2096_v56 = vld [vmem:[#allocation8 + $0x8] sm:$0xff] }
  0x8a   : > { %1245 = vmatpush.bf16.msra.mxu3 %v2126_v21 }
  0x8b   : > { %1207 = vmatpush.bf16.msra.mxu0 %v2101_v10 }
  0x8c   : > { %1220 = vmatpush.bf16.msra.mxu1 %v2109_v11 }
  0x8d   : > { %1233 = vmatpush.bf16.msra.mxu2 %v2117_v19  ;;  %v2128_v19 = vld [vmem:[#allocation10 + $0x8] sm:$0xff] }
  0x8e   : > { %1246 = vmatpush.bf16.msra.mxu3 %v2125_v25  ;;  %v2139_v25 = vld [vmem:[#allocation11 + $0x20] sm:$0xff] }
  0x8f   : > { %1208 = vmatpush.bf16.msra.mxu0 %v2100_v12  ;;  %v2134_v12 = vld [vmem:[#allocation10 + $0x38] sm:$0xff] }
  0x90   : > { %1221 = vmatpush.bf16.msra.mxu1 %v2108_v13  ;;  %v2133_v13 = vld [vmem:[#allocation10 + $0x30] sm:$0xff] }
  0x91   : > { %1234 = vmatpush.bf16.msra.mxu2 %v2116_v23  ;;  %v2141_v23 = vld [vmem:[#allocation11 + $0x30] sm:$0xff] }
  0x92   : > { %1247 = vmatpush.bf16.msra.mxu3 %v2124_v27  ;;  %v2138_v27 = vld [vmem:[#allocation11 + $0x18] sm:$0xff] }
  0x93   : > { %1209 = vmatpush.bf16.msra.mxu0 %v2099_v14  ;;  %v2132_v14 = vld [vmem:[#allocation10 + $0x28] sm:$0xff] }
  0x94   : > { %1222 = vmatpush.bf16.msra.mxu1 %v2107_v15  ;;  %v2131_v15 = vld [vmem:[#allocation10 + $0x20] sm:$0xff] }
  0x95   : > { %1235 = vmatpush.bf16.msra.mxu2 %v2115_v26  ;;  %v2244_v26 = vld [vmem:[%s2768_s4] ss:$0 sm:$0xff] }
  0x96   : > { %1248 = vmatpush.bf16.msra.mxu3 %v2123_v29 }
  0x97   : > { %1210 = vmatpush.bf16.msra.mxu0 %v2098_v16  ;;  %v2130_v16 = vld [vmem:[#allocation10 + $0x18] sm:$0xff] }
  0x98   : > { %1223 = vmatpush.bf16.msra.mxu1 %v2106_v17 }
  0x99   : > { %1236 = vmatpush.bf16.msra.mxu2 %v2114_v28 }
  0x9a   : > { %1249 = vmatpush.bf16.msra.mxu3 %v2122_v32 }
  0x9b   : > { %1211 = vmatpush.bf16.msra.mxu0 %v2097_v18  ;;  %v2129_v18 = vld [vmem:[#allocation10 + $0x10] sm:$0xff] }
  0x9c   : > { %1224 = vmatpush.bf16.msra.mxu1 %v2105_v53 }
  0x9d   : > { %1237 = vmatpush.bf16.msra.mxu2 %v2113_v30  ;;  %v2137_v30 = vld [vmem:[#allocation11 + $0x10] sm:$0xff] }
  0x9e   : > { %1250 = vmatpush.bf16.msra.mxu3 %v2121_v36 }
  0x9f   : > { %1212 = vmatpush.bf16.msra.mxu0 %v2096_v56 }
  0xa0   : > { %1225 = vmatpush.bf16.msra.mxu1 %v2104_v20  ;;  %v2127_v20 = vld [vmem:[#allocation10] sm:$0xff] }
  0xa1   : > { %1238 = vmatpush.bf16.msra.mxu2 %v2112_v34 }
  0xa2   : > { %1251 = vmatpush.bf16.msra.mxu3 %v2120_v42 }
  0xa3   : > { %1213 = vmatpush.bf16.msra.mxu0 %v2095_v22  ;;  %v2142_v22 = vld [vmem:[#allocation11 + $0x38] sm:$0xff] }
  0xa4   : > { %1226 = vmatpush.bf16.msra.mxu1 %v2103_v24  ;;  %v2140_v24 = vld [vmem:[#allocation11 + $0x28] sm:$0xff] }
  0xa5   : > { %1239 = vmatpush.bf16.msra.mxu2 %v2111_v40  ;;  %v2135_v40 = vld [vmem:[#allocation11] sm:$0xff] }
  0xa6   : > { %1252 = vmatpush.bf16.msra.mxu3 %v2119_v50 }
  0xa7   : > { %1328 = vmatpush.bf16.msrb.mxu0 %v2134_v12 }
  0xa8   : > { %1411 = vmatpush.bf16.msrb.mxu1 %v2142_v22 }
  0xab   : > { %1329 = vmatpush.bf16.msrb.mxu0 %v2133_v13 }
  0xac   : > { %1412 = vmatpush.bf16.msrb.mxu1 %v2141_v23 }
  0xaf   : > { %1330 = vmatpush.bf16.msrb.mxu0 %v2132_v14 }
  0xb0   : > { %1413 = vmatpush.bf16.msrb.mxu1 %v2140_v24 }
  0xb3   : > { %1331 = vmatpush.bf16.msrb.mxu0 %v2131_v15 }
  0xb4   : > { %1414 = vmatpush.bf16.msrb.mxu1 %v2139_v25 }
  0xb7   : > { %1332 = vmatpush.bf16.msrb.mxu0 %v2130_v16 }
  0xb8   : > { %1415 = vmatpush.bf16.msrb.mxu1 %v2138_v27 }
  0xbb   : > { %1333 = vmatpush.bf16.msrb.mxu0 %v2129_v18 }
  0xbc   : > { %1416 = vmatpush.bf16.msrb.mxu1 %v2137_v30 }
  0xbf   : > { %1334 = vmatpush.bf16.msrb.mxu0 %v2128_v19 }
  0xc3   : > { %1335 = vmatpush.bf16.msrb.mxu0 %v2127_v20 }
  0xe3   : > { %v843_v35 = vpop.f32.mrf.mxu0 }
  0xe4   : > { %v844_v37 = vadd.f32 %v843_v35, %v499_v33  ;;  %v856_v38 = vpop.f32.mrf.mxu1 }
  0xe6   : > { %v857_v41 = vadd.f32 %v856_v38, %v844_v37 }
  0xe8   : > { %v938_v43 = vmax.f32 %v857_v41, 0.0  ;;  %v2245_v41 = vld [vmem:[%s2770_s6] ss:$0 sm:$0xff] }
  0xea   : > { %v942_v47 = vpack.c.bf16 %v938_v43, %v938_v43 }
  0xeb   : > { %v869_v44 = vpop.f32.mrf.mxu2  ;;  %v845_v49 = vpop.f32.mrf.mxu0 }
  0xec   : > { %v870_v45 = vadd.f32 %v869_v44, %v500_v39  ;;  %v882_v46 = vpop.f32.mrf.mxu3  ;;  %1214 = vmatmul.bf16.vlgmr.msra.gmra.mxu0 %v942_v47  ;;  %v858_v51 = vpop.f32.mrf.mxu1  ;;  %v2136_v39 = vld [vmem:[#allocation11 + $0x8] sm:$0xff] }
  0xed   : > { %1417 = vmatpush.bf16.msrb.mxu1 %v2136_v39  ;;  %v2246_v47 = vld [vmem:[%s2772_s8] ss:$0 sm:$0xff] }
  0xee   : > { %v883_v48 = vadd.f32 %v882_v46, %v870_v45 }
  0xf0   : > { %v939_v52 = vmax.f32 %v883_v48, 0.0 }
  0xf1   : > { %1418 = vmatpush.bf16.msrb.mxu1 %v2135_v40 }
  0xf2   : > { %v943_v54 = vpack.c.bf16 %v939_v52, %v939_v52 }
  0xf3   : > { %v871_v55 = vpop.f32.mrf.mxu2 }
  0xf4   : > { %1227 = vmatmul.bf16.vlgmr.msra.gmra.mxu1 %v943_v54  ;;  %v884_v57 = vpop.f32.mrf.mxu3 }
 0x103   : > { %v895_v59 = vpop.f32.mrf.mxu0 }
 0x104   : > { %v896_v60 = vadd.f32 %v895_v59, %v501_v58  ;;  %v908_v61 = vpop.f32.mrf.mxu1 }
 0x106   : > { %v909_v62 = vadd.f32 %v908_v61, %v896_v60 }
 0x108   : > { %v940_v0 = vmax.f32 %v909_v62, 0.0 }
 0x10a   : > { %v944_v1 = vpack.c.bf16 %v940_v0, %v940_v0 }
 0x10b   : > { %v921_v2 = vpop.f32.mrf.mxu2  ;;  %v897_v5 = vpop.f32.mrf.mxu0 }
 0x10c   : > { %v922_v3 = vadd.f32 %v921_v2, %v502_v63  ;;  %v934_v4 = vpop.f32.mrf.mxu3  ;;  %v910_v6 = vpop.f32.mrf.mxu1  ;;  %1240 = vmatmul.bf16.vlgmr.msra.gmra.mxu2 %v944_v1 }
 0x10e   : > { %v935_v7 = vadd.f32 %v934_v4, %v922_v3 }
 0x110   : > { %v941_v8 = vmax.f32 %v935_v7, 0.0 }
 0x112   : > { %v945_v9 = vpack.c.bf16 %v941_v8, %v941_v8 }
 0x113   : > { %v923_v10 = vpop.f32.mrf.mxu2 }
 0x114   : > { %v936_v11 = vpop.f32.mrf.mxu3  ;;  %1253 = vmatmul.bf16.vlgmr.msra.gmra.mxu3 %v945_v9 }
 0x169   : > { %v1215_v17 = vpop.f32.mrf.mxu0 }
 0x16a   : > { %v1216_v28 = vadd.f32 %v2244_v26, %v1215_v17 }
 0x171   : > { %v1228_v53 = vpop.f32.mrf.mxu1  ;;  %v1217_v56 = vpop.f32.mrf.mxu0 }
 0x172   : > { %v1229_v31 = vadd.f32 %v1228_v53, %v1216_v28 }
 0x179   : > { %v1230_v21 = vpop.f32.mrf.mxu1 }
 0x18f   : > { %v1241_v29 = vpop.f32.mrf.mxu2 }
 0x190   : > { %v1242_v32 = vadd.f32 %v1241_v29, %v1229_v31 }
 0x197   : > { %v1254_v33 = vpop.f32.mrf.mxu3  ;;  %v1243_v35 = vpop.f32.mrf.mxu2 }
 0x198   : > { %v1255_v34 = vadd.f32 %v1254_v33, %v1242_v32 }
 0x19a   : > { %v1258_v36 = vmax.f32 %v1255_v34, 0.0 }
 0x19c   : > { %v1259_v37 = vpack.c.bf16 %v1258_v36, %v1258_v36 }
 0x19e   : > { %1336 = vmatmul.bf16.vlgmr.msrb.gmra.mxu0 %v1259_v37 }
 0x19f   : > { %v1256_v38 = vpop.f32.mrf.mxu3 }
 0x21b   : > { %v1337_v42 = vpop.f32.mrf.mxu0 }
 0x21c   : > { %v1338_v43 = vadd.f32 %v2245_v41, %v1337_v42 }
 0x21e   : > { %v1341_v44 = vmax.f32 %v1338_v43, 0.0 }
 0x220   : > { %v1342_v45 = vpack.c.bf16 %v1341_v44, %v1341_v44 }
 0x222   : > { %1419 = vmatmul.bf16.vlgmr.msrb.gmra.mxu1 %v1342_v45 }
 0x223   : > { %v1339_v46 = vpop.f32.mrf.mxu0 }
 0x29f   : > { %v1420_v48 = vpop.f32.mrf.mxu1 }
 0x2a0   : > { %v1421_v49 = vadd.f32 %v2246_v47, %v1420_v48 }
 0x2a2   : > { %1424 = vst [vmem:[%s431_s27] sm:$0xff] %v1421_v49 }
 0x2a3   : > { %2454 = shalt.err (!%p2451_p9)
}
 0x2a4   : > { %2165 = dma.vmem_to_hbm [thread:$0]  (%p2652_p13), %s1439_s22, 128, %s1441_s2, %s1426_s3  }
 0x2a7   : > { %v1422_v50 = vpop.f32.mrf.mxu1 }
 0x2a8 PF: > { %s1452_s29 = sand.u32 1, %s2493_s30   ;;  %p2786_p10 = scmp.ge.s32.totalorder %s2505_s12, 2 }
 0x2a9   : > { %s1453_s21 = scalar_lea.sflag [#allocation4], %s1452_s29 }
 0x2aa   : > { %p2188_p11 = pnand %p2786_p10, %p2657_p4 }
 0x2ac   : > { %p2189_p0 = pneg %p2188_p11 }
 0x2ae   : > { %2488 = dma.done.wait (%p2189_p0), %s1453_s21, 128  }
 0x2af   : > { %2490 = vsyncadd (%p2189_p0), %s1453_s21, 4294967168  ;;  %p25_p2 = scmp.ge.s32.totalorder %s2632_s18, 4   ;;  %s2787_s30 = smov %s2497_s10 }
 0x2b0   : > { %s2788_s10 = smov %s2501_s11  ;;  %s2789_s11 = smov %s2644_s24 }
 0x2b1   : > { %s2790_s12 = smov %s2632_s18  ;;  %27 = sbr.rel (!%p25_p2) target bundleno = 12 (0xc), region = 121 }
 0x2b6   :  { %1459 = vsyncpa [#allocation3], 1 }
 0x2b7   :  { %1461 = vsyncpa [#allocation3 + $0x1], 1 }
 0x2b8   :  { %1462 = vsyncpa [#allocation6], 1 }
 0x2b9   :  { %1463 = vsyncpa [#allocation9], 1 }
 0x2ba   :  { %1464 = vsyncpa [#allocation12], 1 }
 0x2bb   :  { %1465 = vsyncpa [#allocation4], 1 }
 0x2bc   :  { %1467 = vsyncpa [#allocation4 + $0x1], 1 }

</bundles_post_ra>
